<compile_context>
chip_gen: v7x
topology: tpu7x:2x2x1
jax: 0.10.0
libtpu: 0.0.40
codegen_flags: <defaults>
</compile_context>

<pallas_src>
import numpy as np

import jax
import jax.numpy as jnp
from jax import lax
from jax.experimental import pallas as pl
from jax.experimental.pallas import tpu as pltpu

_EPS = float(np.finfo(np.float32).eps)
_LOG_2PI = float(np.log(2.0 * np.pi))


def _round_up(v, m):
    return ((v + m - 1) // m) * m


def _gaussian_kernel(x_ref, wq_ref, wc_ref, bias_ref, out_ref):
    # x_ref:    (TB, D)   batch tile of activations
    # wq_ref:   (D,  TC)  -0.5 / (covs + eps), transposed, class tile
    # wc_ref:   (D,  TC)  centers / (covs + eps), transposed, class tile
    # bias_ref: (1,  TC)  z_log - 0.5 * sum_d centers^2 / (covs + eps)
    # out_ref:  (TB, TC)  per-(row, class) log-likelihood
    x = x_ref[...]

    # MXU matmuls (f32 accumulate, exact-precision passes so the expanded
    # quadratic form stays within tight tolerance of the (x-c)^2 formulation).
    quad = jnp.dot(x * x, wq_ref[...],
                   preferred_element_type=jnp.float32,
                   precision=lax.Precision.HIGHEST)           # (TB, TC)
    cross = jnp.dot(x, wc_ref[...],
                    preferred_element_type=jnp.float32,
                    precision=lax.Precision.HIGHEST)          # (TB, TC)

    out_ref[...] = (quad + cross + bias_ref[...]).astype(out_ref.dtype)


def _vmem_bytes_estimate(tb, d, tc):
    # Conservative: double-buffered x / out tiles and weights / bias counted as
    # double-buffered too (weights stay resident in practice when there is a
    # single class tile, so this over-estimates on the safe side).
    return 4 * (2 * tb * d + 2 * tb * tc + 2 * 2 * d * tc + 2 * tc)


def gaussian_layer_forward(x, centers, covs, *, batch_tile=None, class_tile=None):
    """Pallas TPU implementation of GaussianLayer.forward.

    x:       (B, D) float32
    centers: (C, D) float32
    covs:    (C, D) float32
    returns  (B, C) float32
    """
    B, D = x.shape
    C, D2 = centers.shape
    assert D == D2 and covs.shape == (C, D)

    x = x.astype(jnp.float32)
    centers = centers.astype(jnp.float32)
    covs = covs.astype(jnp.float32)

    # ---- Hoisted, grid-invariant precompute (runs once, outside the kernel) ----
    cov_eps = covs + _EPS
    inv_cov = 1.0 / cov_eps                                             # (C, D)
    z_log = (-0.5 * jnp.sum(jnp.log(cov_eps), axis=-1)
             - 0.5 * D * _LOG_2PI)                                      # (C,)
    bias = z_log - 0.5 * jnp.sum(centers * centers * inv_cov, axis=-1)  # (C,)
    wq = (-0.5 * inv_cov).T                                             # (D, C)
    wc = (centers * inv_cov).T                                          # (D, C)

    vmem_budget = 24 * 1024 * 1024  # fits v5e / v6e / v7x comfortably

    # ---- Class tiling: lane-aligned (multiple of 128), bounds resident weights ----
    Cp128 = _round_up(max(C, 1), 128)
    if class_tile is None:
        tc = min(Cp128, 2048)
        while tc > 128 and _vmem_bytes_estimate(8, D, tc) > vmem_budget:
            tc = max(128, _round_up(tc // 2, 128))
    else:
        tc = int(class_tile)
        assert tc % 128 == 0, "class_tile must be a multiple of 128"

    # ---- Batch tiling: bounded VMEM, pipelined, megacore-friendly ----
    if batch_tile is None:
        tb = min(512, _round_up(B, 8))
        while tb > 8 and _vmem_bytes_estimate(tb, D, tc) > vmem_budget:
            tb = max(8, _round_up(tb // 2, 8))
    else:
        tb = int(batch_tile)
        assert tb % 8 == 0, "batch_tile must be a multiple of 8"

    Cp = _round_up(max(C, 1), tc)
    Bp = _round_up(B, tb)

    if Cp != C:
        wq = jnp.pad(wq, ((0, 0), (0, Cp - C)))
        wc = jnp.pad(wc, ((0, 0), (0, Cp - C)))
        bias = jnp.pad(bias, ((0, Cp - C),))
    bias = bias.reshape(1, Cp)

    if Bp != B:
        x = jnp.pad(x, ((0, Bp - B), (0, 0)))

    vmem_limit = int(min(64 * 1024 * 1024,
                         max(8 * 1024 * 1024,
                             _vmem_bytes_estimate(tb, D, tc) + 4 * 1024 * 1024)))

    out_padded = pl.pallas_call(
        _gaussian_kernel,
        out_shape=jax.ShapeDtypeStruct((Bp, Cp), jnp.float32),
        grid_spec=pltpu.PrefetchScalarGridSpec(
            num_scalar_prefetch=0,
            grid=(Bp // tb, Cp // tc),
            in_specs=[
                pl.BlockSpec((tb, D), lambda i, j: (i, 0)),   # x batch tile
                pl.BlockSpec((D, tc), lambda i, j: (0, j)),   # wq class tile
                pl.BlockSpec((D, tc), lambda i, j: (0, j)),   # wc class tile
                pl.BlockSpec((1, tc), lambda i, j: (0, j)),   # bias class tile
            ],
            out_specs=pl.BlockSpec((tb, tc), lambda i, j: (i, j)),
        ),
        compiler_params=pltpu.CompilerParams(
            dimension_semantics=("parallel", "parallel"),
            vmem_limit_bytes=vmem_limit),
    )(x, wq, wc, bias)

    return out_padded[:B, :C]


def gaussian_layer_reference(x, centers, covs):
    """Pure-JAX reference matching the PyTorch forward exactly."""
    B, D = x.shape
    covs_eps = covs + _EPS
    diff = x[:, None, :] - centers[None, :, :]                     # (B, C, D)
    z_log = -0.5 * jnp.sum(jnp.log(covs_eps), axis=-1) - 0.5 * D * _LOG_2PI
    exp_log = -0.5 * jnp.sum(diff * (1.0 / covs_eps)[None] * diff, axis=-1)
    return z_log[None, :] + exp_log


# TODO(synk): clip_convs / cov_regulaizer are training-time parameter utilities,
# not part of the forward pass, and are intentionally not implemented as kernels.

if __name__ == "__main__":
    # Small, deterministic setup consistent with GaussianLayer(input_dim, n_classes).
    batch = 8
    input_dim = 32
    n_classes = 4

    key = jax.random.PRNGKey(0)
    kx, kc, kv = jax.random.split(key, 3)

    x = jax.random.normal(kx, (batch, input_dim), dtype=jnp.float32)
    # centers = 0.5 * randn(n_classes, input_dim)
    centers = 0.5 * jax.random.normal(kc, (n_classes, input_dim), dtype=jnp.float32)
    # covs = 0.2 + Exponential(scale=0.3)
    covs = 0.2 + 0.3 * jax.random.exponential(kv, (n_classes, input_dim),
                                              dtype=jnp.float32)

    out = gaussian_layer_forward(x, centers, covs)
    out = jax.block_until_ready(out)

    ref = gaussian_layer_reference(x, centers, covs)
    np.testing.assert_allclose(np.asarray(out), np.asarray(ref),
                               rtol=1e-5, atol=1e-5)

    print("KERNEL_OK")
</pallas_src>

<mosaic_0001>
module attributes {stable_mosaic.version = 11 : i64} {
  func.func @_gaussian_kernel(%arg0: i32, %arg1: i32, %arg2: memref<8x32xf32, #tpu.memory_space<vmem>>, %arg3: memref<32x128xf32, #tpu.memory_space<vmem>>, %arg4: memref<32x128xf32, #tpu.memory_space<vmem>>, %arg5: memref<1x128xf32, #tpu.memory_space<vmem>>, %arg6: memref<8x128xf32, #tpu.memory_space<vmem>>) attributes {dimension_semantics = [#tpu.dimension_semantics<parallel>, #tpu.dimension_semantics<parallel>], iteration_bounds = array<i64: 1, 1>, scalar_prefetch = 0 : i64, scratch_operands = 0 : i64, tpu.core_type = #tpu.core_type<tc>, window_params = [{transform_indices = @transform_0, window_bounds = array<i64: 8, 32>}, {transform_indices = @transform_1, window_bounds = array<i64: 32, 128>}, {transform_indices = @transform_2, window_bounds = array<i64: 32, 128>}, {transform_indices = @transform_3, window_bounds = array<i64: 1, 128>}, {transform_indices = @transform_4, window_bounds = array<i64: 8, 128>}]} {
    %c0 = arith.constant 0 : index
    %c0_0 = arith.constant 0 : index
    %0 = vector.load %arg2[%c0, %c0_0] : memref<8x32xf32, #tpu.memory_space<vmem>>, vector<8x32xf32>
    %1 = arith.mulf %0, %0 : vector<8x32xf32>
    %c0_1 = arith.constant 0 : index
    %c0_2 = arith.constant 0 : index
    %2 = vector.load %arg3[%c0_1, %c0_2] : memref<32x128xf32, #tpu.memory_space<vmem>>, vector<32x128xf32>
    %cst = arith.constant dense<0.000000e+00> : vector<8x128xf32>
    %3 = tpu.matmul %1, %2, %cst {dimension_numbers = #tpu.dot_dimension_numbers<[1], [0], [0], [1], [0, 0, 1, 1], [], []>, precision = #tpu.contract_precision<fp32>} : vector<8x32xf32>, vector<32x128xf32>, vector<8x128xf32> -> vector<8x128xf32>
    %c0_3 = arith.constant 0 : index
    %c0_4 = arith.constant 0 : index
    %4 = vector.load %arg4[%c0_3, %c0_4] : memref<32x128xf32, #tpu.memory_space<vmem>>, vector<32x128xf32>
    %cst_5 = arith.constant dense<0.000000e+00> : vector<8x128xf32>
    %5 = tpu.matmul %0, %4, %cst_5 {dimension_numbers = #tpu.dot_dimension_numbers<[1], [0], [0], [1], [0, 0, 1, 1], [], []>, precision = #tpu.contract_precision<fp32>} : vector<8x32xf32>, vector<32x128xf32>, vector<8x128xf32> -> vector<8x128xf32>
    %6 = arith.addf %3, %5 : vector<8x128xf32>
    %c0_6 = arith.constant 0 : index
    %c0_7 = arith.constant 0 : index
    %7 = vector.load %arg5[%c0_6, %c0_7] : memref<1x128xf32, #tpu.memory_space<vmem>>, vector<1x128xf32>
    %8 = vector.broadcast %7 : vector<1x128xf32> to vector<8x128xf32>
    %9 = arith.addf %6, %8 : vector<8x128xf32>
    %c0_8 = arith.constant 0 : index
    %c0_9 = arith.constant 0 : index
    %10 = vector.load %arg6[%c0_8, %c0_9] : memref<8x128xf32, #tpu.memory_space<vmem>>, vector<8x128xf32>
    tpu.vector_store %arg6[%c0_8, %c0_9], %9 {strides = array<i32>} : memref<8x128xf32, #tpu.memory_space<vmem>>, vector<8x128xf32>,
    return
  }
  func.func @transform_0(%arg0: i32, %arg1: i32) -> (i32, i32) {
    %c0_i32 = arith.constant 0 : i32
    %c0_i32_0 = arith.constant 0 : i32
    return %arg0, %c0_i32 : i32, i32
  }
  func.func @transform_1(%arg0: i32, %arg1: i32) -> (i32, i32) {
    %c0_i32 = arith.constant 0 : i32
    %c0_i32_0 = arith.constant 0 : i32
    return %c0_i32, %arg1 : i32, i32
  }
  func.func @transform_2(%arg0: i32, %arg1: i32) -> (i32, i32) {
    %c0_i32 = arith.constant 0 : i32
    %c0_i32_0 = arith.constant 0 : i32
    return %c0_i32, %arg1 : i32, i32
  }
  func.func @transform_3(%arg0: i32, %arg1: i32) -> (i32, i32) {
    %c0_i32 = arith.constant 0 : i32
    %c0_i32_0 = arith.constant 0 : i32
    return %c0_i32, %arg1 : i32, i32
  }
  func.func @transform_4(%arg0: i32, %arg1: i32) -> (i32, i32) {
    %c0_i32 = arith.constant 0 : i32
    return %arg0, %arg1 : i32, i32
  }
}

</mosaic_0001>

<bundles_post_ra>
// kernel: tpu_custom_call.1
= control target key start
LH: loop header
LB: loop body
LE: loop exit
PB: predicated region body
PF: predicated region fallthrough
CT: control target
= control target key end

     0   :  { %9 = vsyncpa [#allocation3], 0  ;;  %s1640_s0 = inlined_call_operand.hbm [shape: f32[8,32], index: 0, kind: input, shape index: {}]   ;;  %s1641_s1 = inlined_call_operand.hbm [shape: f32[32,128], index: 1, kind: input, shape index: {}]   ;;  %s1642_s2 = inlined_call_operand.hbm [shape: f32[32,128], index: 2, kind: input, shape index: {}]   ;;  %s1643_s3 = inlined_call_operand.vmem [shape: f32[1,128], index: 3, kind: input, shape index: {}]   ;;  %s1644_s4 = inlined_call_operand.hbm [shape: f32[8,128], index: 4, kind: output, shape index: {}]  }
   0x1   :  { %10 = vsyncpa [#allocation6], 0 }
   0x2   :  { %11 = vsyncpa [#allocation4], 0  ;;  %s1437_s15 = smov [#allocation5]   ;;  %s1343_s19 = scalar_lea.hbm %s1641_s1, 512 }
   0x3   :  { %s27_s16 = sshll.u32 %s1437_s15, 4  ;;  %p1344_p0 = scmp.ne.s32.totalorder %s1641_s1, %s1343_s19  ;;  %s28_s16 = int_to_ptr.vmem [resolvable:$true] %s27_s16 }
   0x4   :  { %p1347_p1 = scmp.lt.u32.totalorder %s1343_s19, %s1641_s1 }
   0x6   :  { %p1349_p2 = pnand %p1347_p1, %p1344_p0 }
   0x8   :  { %1352 = shalt.err (!%p1349_p2)
}
   0x9   :  { %s1353_s24 = scalar_lea.vmem %s28_s16, 512  ;;  %p1358_p4 = scmp.lt.s32.totalorder %s28_s16, %s28_s16 }
   0xa   :  { %p1354_p3 = scmp.ne.s32.totalorder %s28_s16, %s1353_s24  ;;  %p1359_p5 = scmp.lt.s32.totalorder %s1353_s24, %s1353_s24 }
   0xc   :  { %p1360_p6 = por %p1359_p5, %p1358_p4 }
   0xe   :  { %p1361_p7 = pnand %p1360_p6, %p1354_p3 }
  0x10   :  { %1364 = shalt.err (!%p1361_p7)
}
  0x11   :  { %s1438_s25 = smov 128   ;;  %s1439_s26 = smov 8  }
  0x12   :  { %33 = dma.hbm_to_vmem [thread:$0]  %s1641_s1, 512, %s28_s16, [#allocation6], %s1438_s25, %s1438_s25, %s1439_s26  }
  0x13   :  { %s1440_s29 = smov [#allocation2]   ;;  %s1441_s5 = smov [#allocation7]  }
  0x14   :  { %s18_s30 = sshll.u32 %s1440_s29, 4  ;;  %s39_s6 = sshll.u32 %s1441_s5, 4  ;;  %s19_s30 = int_to_ptr.vmem [resolvable:$true] %s18_s30  ;;  %s40_s6 = int_to_ptr.vmem [resolvable:$true] %s39_s6 }
  0x15   :  { %s1365_s9 = scalar_lea.hbm %s1640_s0, 128 }
  0x16   :  { %p1366_p8 = scmp.ne.s32.totalorder %s1640_s0, %s1365_s9  ;;  %p1369_p9 = scmp.lt.u32.totalorder %s1365_s9, %s1640_s0 }
  0x18   :  { %p1371_p10 = pnand %p1369_p9, %p1366_p8 }
  0x1a   :  { %1374 = shalt.err (!%p1371_p10)
}
  0x1b   :  { %s1375_s1 = scalar_lea.vmem %s19_s30, 128  ;;  %p1380_p12 = scmp.lt.s32.totalorder %s19_s30, %s19_s30 }
  0x1c   :  { %p1376_p11 = scmp.ne.s32.totalorder %s19_s30, %s1375_s1  ;;  %p1381_p13 = scmp.lt.s32.totalorder %s1375_s1, %s1375_s1 }
  0x1e   :  { %p1382_p0 = por %p1381_p13, %p1380_p12 }
  0x20   :  { %p1383_p1 = pnand %p1382_p0, %p1376_p11 }
  0x22   :  { %1386 = shalt.err (!%p1383_p1)
}
  0x23   :  { %21 = dma.hbm_to_vmem [thread:$0]  %s1640_s0, 128, %s19_s30, [#allocation3]  }
  0x24   :  { %s1387_s18 = scalar_lea.hbm %s1642_s2, 512 }
  0x25   :  { %p1388_p2 = scmp.ne.s32.totalorder %s1642_s2, %s1387_s18  ;;  %p1391_p3 = scmp.lt.u32.totalorder %s1387_s18, %s1642_s2 }
  0x27   :  { %p1393_p4 = pnand %p1391_p3, %p1388_p2 }
  0x29   :  { %1396 = shalt.err (!%p1393_p4)
}
  0x2a   :  { %s1397_s23 = scalar_lea.vmem %s40_s6, 512  ;;  %p1402_p6 = scmp.lt.s32.totalorder %s40_s6, %s40_s6 }
  0x2b   :  { %p1398_p5 = scmp.ne.s32.totalorder %s40_s6, %s1397_s23  ;;  %p1403_p7 = scmp.lt.s32.totalorder %s1397_s23, %s1397_s23 }
  0x2d   :  { %p1404_p8 = por %p1403_p7, %p1402_p6 }
  0x2f   :  { %p1405_p9 = pnand %p1404_p8, %p1398_p5 }
  0x31   :  { %1408 = shalt.err (!%p1405_p9)
}
  0x32   :  { %45 = dma.hbm_to_vmem [thread:$0]  %s1642_s2, 512, %s40_s6, [#allocation6], %s1438_s25, %s1438_s25, %s1439_s26  }
  0x33   :  { %1431 = dma.done.wait [#allocation3], 128  }
  0x34   :  { %1432 = vsyncadd [#allocation3], 4294967168 }
  0x35   :  { %1433 = dma.done.wait [#allocation6], 1024  }
  0x36   :  { %1434 = vsyncadd [#allocation6], 4294966272  ;;  %v1442_v0 = vmov 0.0|0.0   ;;  %vm1443_vm0 = vmmov 0   ;;  %v1444_v1 = vmov 0.0   ;;  %vm67_vm1 = vcmask 261120  }
  0x37   :  { %1262 = vmatprep.subr.bf16.mxu0 %v1442_v0  ;;  %1268 = vmatprep.subr.bf16.mxu1 %v1442_v0  ;;  %v63_v2 = vld [vmem:[#allocation7] sm:$0xff]  ;;  %v64_v3 = vld [vmem:[#allocation7 + $0x8] sm:$0xff]  ;;  %v65_v4 = vld [vmem:[#allocation7 + $0x10] sm:$0xff]  ;;  %s1445_s26 = smov [#allocation8]  }
  0x38   :  { %1138 = vmatprep.mubr.msk.f32.mxu0 %vm1443_vm0, %v1444_v1  ;;  %1149 = vmatprep.mubr.msk.f32.mxu1 %vm1443_vm0, %v1444_v1  ;;  %v72_v5 = vand.u32 4294901760, %v63_v2  ;;  %v75_v6 = vand.u32 4294901760, %v64_v3  ;;  %v66_v7 = vld [vmem:[#allocation7 + $0x18] sm:$0xff]  ;;  %v78_v8 = vand.u32 4294901760, %v65_v4  ;;  %v59_v34 = vld [vmem:[#allocation5] sm:$0xff]  ;;  %v60_v35 = vld [vmem:[#allocation5 + $0x8] sm:$0xff] }
  0x39   :  { %v57_v9 = vld [vmem:[#allocation2] sm:$0xff]  ;;  %v81_v10 = vand.u32 4294901760, %v66_v7  ;;  %v560_v41 = vand.u32 4294901760, %v59_v34  ;;  %v563_v42 = vand.u32 4294901760, %v60_v35  ;;  %v61_v43 = vld [vmem:[#allocation5 + $0x10] sm:$0xff]  ;;  %s1059_s27 = sshll.u32 %s1445_s26, 4  ;;  %s1060_s27 = int_to_ptr.vmem [resolvable:$true] %s1059_s27 }
  0x3a   :  { %v69_v11 = vsel %vm67_vm1, %v57_v9, 0  ;;  %v1520_v12 = vpack.c.bf16 %v75_v6, %v72_v5  ;;  %v152_v13 = vsub.f32 %v63_v2, %v72_v5  ;;  %v159_v14 = vsub.f32 %v64_v3, %v75_v6  ;;  %v62_v44 = vld [vmem:[#allocation5 + $0x18] sm:$0xff]  ;;  %s1409_s28 = scalar_lea.vmem %s1060_s27, 128  ;;  %p1414_p11 = scmp.lt.s32.totalorder %s1060_s27, %s1060_s27 }
  0x3b   :  { %v1522_v15 = vsub.f32 %v65_v4, %v78_v8  ;;  %v1524_v16 = vsub.f32 %v66_v7, %v81_v10  ;;  %v1526_v17 = vand.u32 4294901760, %v69_v11  ;;  %v1529_v18 = vpack.c.bf16 %v81_v10, %v78_v8  ;;  %p1410_p10 = scmp.ne.s32.totalorder %s1060_s27, %s1409_s28  ;;  %p1415_p12 = scmp.lt.s32.totalorder %s1409_s28, %s1409_s28 }
  0x3c   :  { %1264 = vmatpush3.bf16.msra.mxu0 %v1520_v12  ;;  %v153_v19 = vand.u32 4294901760, %v152_v13  ;;  %v160_v20 = vand.u32 4294901760, %v159_v14  ;;  %v58_v37 = vmul.f32 %v57_v9, %v57_v9  ;;  %v1275_v38 = vpack.c.bf16 %v159_v14, %v152_v13 }
  0x3d   :  { %1265 = vmatprep.subr.bf16.mxu0 %v1442_v0  ;;  %v1533_v21 = vsub.f32 %v69_v11, %v1526_v17  ;;  %v167_v22 = vand.u32 4294901760, %v1522_v15  ;;  %v174_v23 = vand.u32 4294901760, %v1524_v16  ;;  %v1278_v46 = vpack.c.bf16 %v1524_v16, %v1522_v15  ;;  %p1416_p13 = por %p1415_p12, %p1414_p11 }
  0x3e   :  { %v154_v24 = vsub.f32 %v152_v13, %v153_v19  ;;  %v161_v25 = vsub.f32 %v159_v14, %v160_v20  ;;  %v557_v45 = vsel %vm67_vm1, %v58_v37, 0  ;;  %v1550_v47 = vsub.f32 %v59_v34, %v560_v41 }
  0x3f   :  { %v142_v26 = vand.u32 4294901760, %v1533_v21  ;;  %v168_v27 = vsub.f32 %v1522_v15, %v167_v22  ;;  %v175_v28 = vsub.f32 %v1524_v16, %v174_v23  ;;  %v1552_v48 = vsub.f32 %v60_v35, %v563_v42  ;;  %p1417_p0 = pnand %p1416_p13, %p1410_p10 }
  0x40   :  { %1267 = vmatpush3.bf16.msra.mxu0 %v1529_v18  ;;  %v155_v29 = vand.u32 4294901760, %v154_v24  ;;  %v162_v30 = vand.u32 4294901760, %v161_v25  ;;  %v566_v49 = vand.u32 4294901760, %v61_v43  ;;  %v569_v50 = vand.u32 4294901760, %v62_v44 }
  0x41   :  { %1274 = vmatprep.subr.bf16.mxu0 %v1442_v0  ;;  %v143_v31 = vsub.f32 %v1533_v21, %v142_v26  ;;  %v169_v32 = vand.u32 4294901760, %v168_v27  ;;  %v176_v33 = vand.u32 4294901760, %v175_v28  ;;  %v1554_v51 = vand.u32 4294901760, %v557_v45 }
  0x42   :  { %v1269_v36 = vpack.c.bf16 %v162_v30, %v155_v29  ;;  %v1287_v52 = vpack.c.bf16 %v160_v20, %v153_v19  ;;  %v1562_v53 = vsub.f32 %v61_v43, %v566_v49  ;;  %v1564_v54 = vsub.f32 %v62_v44, %v569_v50 }
  0x43   :  { %v144_v39 = vand.u32 4294901760, %v143_v31  ;;  %v1272_v40 = vpack.c.bf16 %v176_v33, %v169_v32  ;;  %v641_v55 = vand.u32 4294901760, %v1550_v47  ;;  %v648_v56 = vand.u32 4294901760, %v1552_v48 }
  0x44   :  { %1270 = vmatpush3.bf16.msra.mxu1 %v1269_v36  ;;  %v1571_v57 = vsub.f32 %v557_v45, %v1554_v51  ;;  %v1290_v58 = vpack.c.bf16 %v174_v23, %v167_v22  ;;  %v655_v61 = vand.u32 4294901760, %v1562_v53  ;;  %v662_v62 = vand.u32 4294901760, %v1564_v54 }
  0x45   :  { %1139 = vmatmul.mubr.f32.vlgmr.msra.gmra.mrb[0].mxu0 %v144_v39  ;;  %1271 = vmatprep.subr.bf16.mxu1 %v1442_v0  ;;  %v642_v59 = vsub.f32 %v1550_v47, %v641_v55  ;;  %v649_v60 = vsub.f32 %v1552_v48, %v648_v56  ;;  %v1299_v2 = vpack.c.bf16 %v563_v42, %v560_v41 }
  0x46   :  { %1276 = vmatpush3.bf16.msra.mxu0 %v1275_v38  ;;  %1160 = vmatprep.mubr.msk.f32.mxu0 %vm1443_vm0, %v1444_v1  ;;  %v630_v63 = vand.u32 4294901760, %v1571_v57  ;;  %v656_v5 = vsub.f32 %v1562_v53, %v655_v61  ;;  %v663_v6 = vsub.f32 %v1564_v54, %v662_v62  ;;  %v1302_v8 = vpack.c.bf16 %v569_v50, %v566_v49  ;;  %v1069_v49 = vld [vmem:[%s1643_s3] ss:$0 sm:$0xff] }
  0x47   :  { %1277 = vmatprep.subr.bf16.mxu0 %v1442_v0  ;;  %v643_v3 = vand.u32 4294901760, %v642_v59  ;;  %v650_v4 = vand.u32 4294901760, %v649_v60  ;;  %v1311_v13 = vpack.c.bf16 %v1552_v48, %v1550_v47  ;;  %v1314_v15 = vpack.c.bf16 %v1564_v54, %v1562_v53 }
  0x48   :  { %1273 = vmatpush3.bf16.msra.mxu1 %v1272_v40  ;;  %v631_v7 = vsub.f32 %v1571_v57, %v630_v63  ;;  %v657_v10 = vand.u32 4294901760, %v656_v5  ;;  %v664_v11 = vand.u32 4294901760, %v663_v6  ;;  %v1323_v16 = vpack.c.bf16 %v648_v56, %v641_v55 }
  0x49   :  { %1280 = vmatprep.subr.bf16.mxu1 %v1442_v0  ;;  %v1305_v9 = vpack.c.bf16 %v650_v4, %v643_v3 }
  0x4a   :  { %1279 = vmatpush3.bf16.msra.mxu0 %v1278_v46  ;;  %v1308_v14 = vpack.c.bf16 %v664_v11, %v657_v10 }
  0x4b   :  { %1150 = vmatmul.mubr.f32.vlgmr.msra.gmra.mrb[0].mxu1 %v1526_v17  ;;  %1286 = vmatprep.subr.bf16.mxu0 %v1442_v0 }
  0x4c   :  { %1282 = vmatpush3.bf16.msra.mxu1 %v1520_v12  ;;  %1171 = vmatprep.mubr.msk.f32.mxu1 %vm1443_vm0, %v1444_v1 }
  0x4d   :  { %1161 = vmatmul.mubr.f32.vlgmr.msra.gmra.mrb[2].mxu0 %v1533_v21  ;;  %1283 = vmatprep.subr.bf16.mxu1 %v1442_v0 }
  0x4e   :  { %1288 = vmatpush3.bf16.msra.mxu0 %v1287_v52  ;;  %1182 = vmatprep.mubr.msk.f32.mxu0 %vm1443_vm0, %v1444_v1 }
  0x4f   :  { %1289 = vmatprep.subr.bf16.mxu0 %v1442_v0 }
  0x50   :  { %1285 = vmatpush3.bf16.msra.mxu1 %v1529_v18 }
  0x51   :  { %1292 = vmatprep.subr.bf16.mxu1 %v1442_v0 }
  0x52   :  { %1291 = vmatpush3.bf16.msra.mxu0 %v1290_v58 }
  0x53   :  { %1172 = vmatmul.mubr.f32.vlgmr.msra.gmra.mrb[2].mxu1 %v142_v26  ;;  %1298 = vmatprep.subr.bf16.mxu0 %v1442_v0 }
  0x54   :  { %1294 = vmatpush3.bf16.msra.mxu1 %v1520_v12  ;;  %1193 = vmatprep.mubr.msk.f32.mxu1 %vm1443_vm0, %v1444_v1  ;;  %v632_v12 = vand.u32 4294901760, %v631_v7 }
  0x55   :  { %1183 = vmatmul.mubr.f32.vlgmr.msra.gmra.mrb[4].mxu0 %v1526_v17  ;;  %1295 = vmatprep.subr.bf16.mxu1 %v1442_v0 }
  0x56   :  { %1300 = vmatpush3.bf16.msra.mxu0 %v1299_v2  ;;  %1204 = vmatprep.mubr.msk.f32.mxu0 %vm1443_vm0, %v1444_v1 }
  0x57   :  { %1301 = vmatprep.subr.bf16.mxu0 %v1442_v0 }
  0x58   :  { %1297 = vmatpush3.bf16.msra.mxu1 %v1529_v18 }
  0x59   :  { %1304 = vmatprep.subr.bf16.mxu1 %v1442_v0 }
  0x5a   :  { %1303 = vmatpush3.bf16.msra.mxu0 %v1302_v8 }
  0x5b   :  { %1194 = vmatmul.mubr.f32.vlgmr.msra.gmra.mrb[4].mxu1 %v1526_v17  ;;  %1310 = vmatprep.subr.bf16.mxu0 %v1442_v0  ;;  %v1326_v17 = vpack.c.bf16 %v662_v62, %v655_v61 }
  0x5c   :  { %1306 = vmatpush3.bf16.msra.mxu1 %v1305_v9  ;;  %1215 = vmatprep.mubr.msk.f32.mxu1 %vm1443_vm0, %v1444_v1 }
  0x5d   :  { %1205 = vmatmul.mubr.f32.vlgmr.msra.gmra.mrb[6].mxu0 %v632_v12  ;;  %1307 = vmatprep.subr.bf16.mxu1 %v1442_v0 }
  0x5e   :  { %1312 = vmatpush3.bf16.msra.mxu0 %v1311_v13  ;;  %1226 = vmatprep.mubr.msk.f32.mxu0 %vm1443_vm0, %v1444_v1 }
  0x5f   :  { %1313 = vmatprep.subr.bf16.mxu0 %v1442_v0 }
  0x60   :  { %1309 = vmatpush3.bf16.msra.mxu1 %v1308_v14 }
  0x61   :  { %1316 = vmatprep.subr.bf16.mxu1 %v1442_v0 }
  0x62   :  { %1315 = vmatpush3.bf16.msra.mxu0 %v1314_v15 }
  0x63   :  { %1216 = vmatmul.mubr.f32.vlgmr.msra.gmra.mrb[6].mxu1 %v1554_v51  ;;  %1322 = vmatprep.subr.bf16.mxu0 %v1442_v0 }
  0x64   :  { %1318 = vmatpush3.bf16.msra.mxu1 %v1299_v2  ;;  %1237 = vmatprep.mubr.msk.f32.mxu1 %vm1443_vm0, %v1444_v1 }
  0x65   :  { %1227 = vmatmul.mubr.f32.vlgmr.msra.gmra.mrb[8].mxu0 %v1571_v57  ;;  %1319 = vmatprep.subr.bf16.mxu1 %v1442_v0 }
  0x66   :  { %1324 = vmatpush3.bf16.msra.mxu0 %v1323_v16  ;;  %1248 = vmatprep.mubr.msk.f32.mxu0 %vm1443_vm0, %v1444_v1 }
  0x67   :  { %1325 = vmatprep.subr.bf16.mxu0 %v1442_v0 }
  0x68   :  { %1321 = vmatpush3.bf16.msra.mxu1 %v1302_v8 }
  0x69   :  { %1328 = vmatprep.subr.bf16.mxu1 %v1442_v0 }
  0x6a   :  { %1327 = vmatpush3.bf16.msra.mxu0 %v1326_v17 }
  0x6b   :  { %1238 = vmatmul.mubr.f32.vlgmr.msra.gmra.mrb[8].mxu1 %v630_v63 }
  0x6c   :  { %1330 = vmatpush3.bf16.msra.mxu1 %v1299_v2  ;;  %1259 = vmatprep.mubr.msk.f32.mxu1 %vm1443_vm0, %v1444_v1 }
  0x6d   :  { %1249 = vmatmul.mubr.f32.vlgmr.msra.gmra.mrb[10].mxu0 %v1554_v51  ;;  %1331 = vmatprep.subr.bf16.mxu1 %v1442_v0 }
  0x70   :  { %1333 = vmatpush3.bf16.msra.mxu1 %v1302_v8 }
  0x73   :  { %1260 = vmatmul.mubr.f32.vlgmr.msra.gmra.mrb[10].mxu1 %v1554_v51 }
 0x118   :  { %v146_v18 = vpop.f32.mrb[0].mxu0 }
 0x119   :  { %v1140_v19 = vpop.f32.mrb[1].mxu0 }
 0x11e   :  { %v237_v20 = vpop.f32.mrb[0].mxu1 }
 0x11f   :  { %v238_v21 = vadd.f32 %v237_v20, %v146_v18  ;;  %v1151_v22 = vpop.f32.mrb[1].mxu1 }
 0x120   :  { %v317_v23 = vpop.f32.mrb[2].mxu0 }
 0x121   :  { %v318_v24 = vadd.f32 %v317_v23, %v238_v21  ;;  %v1162_v25 = vpop.f32.mrb[3].mxu0 }
 0x126   :  { %v394_v26 = vpop.f32.mrb[2].mxu1 }
 0x127   :  { %v395_v27 = vadd.f32 %v394_v26, %v318_v24  ;;  %v1173_v28 = vpop.f32.mrb[3].mxu1 }
 0x128   :  { %v477_v29 = vpop.f32.mrb[4].mxu0 }
 0x129   :  { %v478_v1 = vadd.f32 %v477_v29, %v395_v27  ;;  %v1184_v30 = vpop.f32.mrb[5].mxu0 }
 0x12e   :  { %v552_v31 = vpop.f32.mrb[4].mxu1 }
 0x12f   :  { %v553_v32 = vadd.f32 %v552_v31, %v478_v1  ;;  %v1195_v0 = vpop.f32.mrb[5].mxu1 }
 0x130   :  { %v634_v33 = vpop.f32.mrb[6].mxu0 }
 0x131   :  { %v635_v34 = vadd.f32 %v634_v33, %v553_v32  ;;  %v1206_v35 = vpop.f32.mrb[7].mxu0 }
 0x136   :  { %v725_v36 = vpop.f32.mrb[6].mxu1 }
 0x137   :  { %v726_v37 = vadd.f32 %v725_v36, %v635_v34  ;;  %v1217_v38 = vpop.f32.mrb[7].mxu1 }
 0x138   :  { %v805_v39 = vpop.f32.mrb[8].mxu0 }
 0x139   :  { %v806_v40 = vadd.f32 %v805_v39, %v726_v37  ;;  %v1228_v41 = vpop.f32.mrb[9].mxu0 }
 0x13e   :  { %v882_v42 = vpop.f32.mrb[8].mxu1 }
 0x13f   :  { %v883_v43 = vadd.f32 %v882_v42, %v806_v40  ;;  %v1239_v44 = vpop.f32.mrb[9].mxu1 }
 0x140   :  { %v965_v45 = vpop.f32.mrb[10].mxu0 }
 0x141   :  { %v966_v46 = vadd.f32 %v965_v45, %v883_v43  ;;  %v1250_v47 = vpop.f32.mrb[11].mxu0 }
 0x146   :  { %v1040_v48 = vpop.f32.mrb[10].mxu1 }
 0x147   :  { %v1041_v50 = vadd.f32 %v1040_v48, %v966_v46  ;;  %v1261_v51 = vpop.f32.mrb[11].mxu1 }
 0x149   :  { %v1051_v52 = vadd.f32 %v1069_v49, %v1041_v50 }
 0x14b   :  { %1052 = vst [vmem:[#allocation8] sm:$0xff] %v1051_v52 }
 0x14c   :  { %1420 = shalt.err (!%p1417_p0)
}
 0x14d   :  { %s1421_s5 = scalar_lea.hbm %s1644_s4, 128 }
 0x14e   :  { %p1422_p1 = scmp.ne.s32.totalorder %s1644_s4, %s1421_s5  ;;  %p1425_p2 = scmp.lt.u32.totalorder %s1421_s5, %s1644_s4 }
 0x150   :  { %p1427_p3 = pnand %p1425_p2, %p1422_p1 }
 0x152   :  { %1430 = shalt.err (!%p1427_p3)
}
 0x153   :  { %1062 = dma.vmem_to_hbm [thread:$0]  %s1060_s27, 128, %s1644_s4, [#allocation4]  }
 0x154   :  { %1435 = dma.done.wait [#allocation4], 128  }
 0x155   :  { %1436 = vsyncadd [#allocation4], 4294967168 }
 0x156   :  { %1066 = vsyncpa [#allocation3], 1 }
 0x157   :  { %1067 = vsyncpa [#allocation6], 1 }
 0x158   :  { %1068 = vsyncpa [#allocation4], 1 }

</bundles_post_ra>
